<compile_context>
chip_gen: v5e
topology: v5e:2x2
jax: 0.10.0
libtpu: 0.0.40
codegen_flags: <defaults>
</compile_context>

<pallas_src>
import functools
import math

import jax
import jax.numpy as jnp
from jax.experimental import pallas as pl
from jax.experimental.pallas import tpu as pltpu


# ----------------------------------------------------------------------------
# Synthetic BERT config
# ----------------------------------------------------------------------------
VOCAB = 100
MAX_POS = 16
TYPE_VOCAB = 2
HIDDEN = 32
NUM_HEADS = 4
HEAD_DIM = HIDDEN // NUM_HEADS
INTERMEDIATE = 64
NUM_LAYERS = 2
NUM_LABELS = 3
LANE = 128          # lane width for the padded classifier output (lane-dense store)
EPS = 1e-12

_GELU_C = math.sqrt(2.0 / math.pi)   # Python float -> jaxpr literal (not a captured const)


# ----------------------------------------------------------------------------
# In-kernel helpers (fp32 elementwise / transcendental; bf16 only at the MXU)
# ----------------------------------------------------------------------------
def _gelu_tanh(x):
    # TODO(synk): HF bert-base uses exact erf-GELU; tanh approximation differs slightly.
    return 0.5 * x * (1.0 + jnp.tanh(_GELU_C * (x + 0.044715 * x * x * x)))


def _layernorm(x, g, b, eps):
    mu = jnp.mean(x, axis=-1, keepdims=True)
    var = jnp.mean((x - mu) * (x - mu), axis=-1, keepdims=True)
    return (x - mu) * jax.lax.rsqrt(var + eps) * g + b


# ----------------------------------------------------------------------------
# Pallas kernels
# ----------------------------------------------------------------------------
def embed_ln_kernel(x_ref, g_ref, b_ref, o_ref, *, eps):
    # embedding LayerNorm; fp32 math, bf16 store (halves activation HBM traffic)
    o_ref[...] = _layernorm(x_ref[...], g_ref[...], b_ref[...], eps).astype(o_ref.dtype)


def encoder_layer_kernel(x_ref, bias_ref,
                         wqkv_ref, bqkv_ref, wo_ref, bo_ref,
                         ln1g_ref, ln1b_ref,
                         w1_ref, b1_ref, w2_ref, b2_ref,
                         ln2g_ref, ln2b_ref,
                         o_ref, *, scale, eps, num_heads, head_dim):
    """One full BERT encoder layer for one batch element (grid over batch)."""
    hdim = num_heads * head_dim

    x_bf = x_ref[0]                                  # (S, H) bf16 activations
    x_f32 = x_bf.astype(jnp.float32)
    bias = bias_ref[0]                               # (1, S) additive mask bias (fp32)

    # ---- fused QKV projection (one MXU call; weights already bf16) ----
    qkv = jnp.dot(x_bf, wqkv_ref[...],
                  preferred_element_type=jnp.float32) + bqkv_ref[...]   # (S, 3H) fp32

    # ---- per-head attention; heads merged back lane-dense as (S, H) ----
    ctx_heads = []
    for h in range(num_heads):
        q_h = qkv[:, h * head_dim:(h + 1) * head_dim] * scale
        k_h = qkv[:, hdim + h * head_dim: hdim + (h + 1) * head_dim]
        v_h = qkv[:, 2 * hdim + h * head_dim: 2 * hdim + (h + 1) * head_dim]
        s = jax.lax.dot_general(q_h.astype(jnp.bfloat16), k_h.astype(jnp.bfloat16),
                                (((1,), (1,)), ((), ())),
                                preferred_element_type=jnp.float32)      # (S, S)
        s = s + bias
        s = s - jnp.max(s, axis=-1, keepdims=True)
        p = jnp.exp(s)                                                   # fp32 softmax
        p = p * pl.reciprocal(jnp.sum(p, axis=-1, keepdims=True), approx=True)
        ctx_heads.append(jnp.dot(p.astype(jnp.bfloat16), v_h.astype(jnp.bfloat16),
                                 preferred_element_type=jnp.float32))    # (S, dh)
    ctx = jnp.concatenate(ctx_heads, axis=1)                             # (S, H) fp32

    # ---- attention output projection + residual + LayerNorm ----
    attn = jnp.dot(ctx.astype(jnp.bfloat16), wo_ref[...],
                   preferred_element_type=jnp.float32) + bo_ref[...]
    y1 = _layernorm(attn + x_f32, ln1g_ref[...], ln1b_ref[...], eps)     # (S, H) fp32

    # ---- FFN1 + GELU + FFN2 + residual + LayerNorm ----
    h1 = _gelu_tanh(jnp.dot(y1.astype(jnp.bfloat16), w1_ref[...],
                            preferred_element_type=jnp.float32) + b1_ref[...])
    y2 = jnp.dot(h1.astype(jnp.bfloat16), w2_ref[...],
                 preferred_element_type=jnp.float32) + b2_ref[...]
    out = _layernorm(y2 + y1, ln2g_ref[...], ln2b_ref[...], eps)

    o_ref[0] = out.astype(o_ref.dtype)               # bf16 store, (S, H) lane layout


def pooler_classifier_kernel(cls_ref, wp_ref, bp_ref, wc_ref, bc_ref, o_ref):
    # fused tanh pooler on [CLS] + classifier (output lane-padded to 128)
    pooled = jnp.tanh(jnp.dot(cls_ref[...], wp_ref[...],
                              preferred_element_type=jnp.float32) + bp_ref[...])
    o_ref[...] = jnp.dot(pooled.astype(jnp.bfloat16), wc_ref[...],
                         preferred_element_type=jnp.float32) + bc_ref[...]


# ----------------------------------------------------------------------------
# pallas_call wrappers (toy shapes => fully VMEM-resident fused kernels)
# ----------------------------------------------------------------------------
def pallas_embed_ln(x2d, g, b, eps=EPS):
    M, D = x2d.shape
    return pl.pallas_call(
        functools.partial(embed_ln_kernel, eps=eps),
        out_shape=jax.ShapeDtypeStruct((M, D), jnp.bfloat16),
        grid=(1,),
        in_specs=[pl.BlockSpec((M, D), lambda i: (0, 0)),
                  pl.BlockSpec((1, D), lambda i: (0, 0)),
                  pl.BlockSpec((1, D), lambda i: (0, 0))],
        out_specs=pl.BlockSpec((M, D), lambda i: (0, 0)),
    )(x2d, g, b)


def pallas_encoder_layer(x, mask_bias, layer, *, scale, eps):
    B, S, H = x.shape
    inter = layer["w1"].shape[1]

    def w2d(shape):
        return pl.BlockSpec(shape, lambda b: (0, 0))

    in_specs = [
        pl.BlockSpec((1, S, H), lambda b: (b, 0, 0)),       # x (bf16)
        pl.BlockSpec((1, 1, S), lambda b: (b, 0, 0)),       # additive mask bias (fp32)
        w2d((H, 3 * H)), w2d((1, 3 * H)),                   # wqkv (bf16), bqkv
        w2d((H, H)), w2d((1, H)),                           # wo (bf16), bo
        w2d((1, H)), w2d((1, H)),                           # ln1 gamma, beta
        w2d((H, inter)), w2d((1, inter)),                   # ffn1 w (bf16), b
        w2d((inter, H)), w2d((1, H)),                       # ffn2 w (bf16), b
        w2d((1, H)), w2d((1, H)),                           # ln2 gamma, beta
    ]
    return pl.pallas_call(
        functools.partial(encoder_layer_kernel, scale=scale, eps=eps,
                          num_heads=NUM_HEADS, head_dim=HEAD_DIM),
        out_shape=jax.ShapeDtypeStruct((B, S, H), jnp.bfloat16),
        grid=(B,),
        in_specs=in_specs,
        out_specs=pl.BlockSpec((1, S, H), lambda b: (b, 0, 0)),
        compiler_params=pltpu.CompilerParams(
            dimension_semantics=("parallel",)),             # batch shards across TCs (v7x)
    )(x, mask_bias,
      layer["wqkv"], layer["bqkv"], layer["wo"], layer["bo"],
      layer["ln1_g"], layer["ln1_b"],
      layer["w1"], layer["b1"], layer["w2"], layer["b2"],
      layer["ln2_g"], layer["ln2_b"])


def pallas_pooler_classifier(cls2d, wp, bp, wc_pad, bc_pad):
    B, D = cls2d.shape
    NP = wc_pad.shape[1]
    return pl.pallas_call(
        pooler_classifier_kernel,
        out_shape=jax.ShapeDtypeStruct((B, NP), jnp.float32),
        grid=(1,),
        in_specs=[pl.BlockSpec((B, D), lambda i: (0, 0)),
                  pl.BlockSpec((D, D), lambda i: (0, 0)),
                  pl.BlockSpec((1, D), lambda i: (0, 0)),
                  pl.BlockSpec((D, NP), lambda i: (0, 0)),
                  pl.BlockSpec((1, NP), lambda i: (0, 0))],
        out_specs=pl.BlockSpec((B, NP), lambda i: (0, 0)),
    )(cls2d, wp, bp, wc_pad, bc_pad)


# ----------------------------------------------------------------------------
# Deterministic parameter build: fused QKV, bf16 weights, padded classifier.
# ----------------------------------------------------------------------------
def build_params(key):
    def dense(k, fan_in, fan_out):
        kw, _ = jax.random.split(k)
        return (0.02 * jax.random.normal(kw, (fan_in, fan_out), jnp.float32),
                jnp.zeros((fan_out,), jnp.float32))

    keys = jax.random.split(key, 8 + NUM_LAYERS)
    H, I = HIDDEN, INTERMEDIATE
    params = {
        "word_emb": 0.02 * jax.random.normal(keys[0], (VOCAB, H), jnp.float32),
        "pos_emb": 0.02 * jax.random.normal(keys[1], (MAX_POS, H), jnp.float32),
        "type_emb": 0.02 * jax.random.normal(keys[2], (TYPE_VOCAB, H), jnp.float32),
        "emb_ln_g": jnp.ones((1, H), jnp.float32),
        "emb_ln_b": jnp.zeros((1, H), jnp.float32),
        "layers": [],
    }
    for li in range(NUM_LAYERS):
        lk = jax.random.split(keys[3 + li], 6)
        wq, bq = dense(lk[0], H, H)
        wk, bk = dense(lk[1], H, H)
        wv, bv = dense(lk[2], H, H)
        wo, bo = dense(lk[3], H, H)
        w1, b1 = dense(lk[4], H, I)
        w2, b2 = dense(lk[5], I, H)
        params["layers"].append({
            # weights stored bf16 once (half DMA bytes, no per-call casts);
            # biases / LN params stay fp32 (added to fp32 accumulators).
            "wqkv": jnp.concatenate([wq, wk, wv], axis=1).astype(jnp.bfloat16),
            "bqkv": jnp.concatenate([bq, bk, bv], axis=0).reshape(1, 3 * H),
            "wo": wo.astype(jnp.bfloat16), "bo": bo.reshape(1, H),
            "ln1_g": jnp.ones((1, H), jnp.float32),
            "ln1_b": jnp.zeros((1, H), jnp.float32),
            "w1": w1.astype(jnp.bfloat16), "b1": b1.reshape(1, I),
            "w2": w2.astype(jnp.bfloat16), "b2": b2.reshape(1, H),
            "ln2_g": jnp.ones((1, H), jnp.float32),
            "ln2_b": jnp.zeros((1, H), jnp.float32),
        })
    wp, bp = dense(keys[3 + NUM_LAYERS], H, H)
    wc, bc = dense(keys[4 + NUM_LAYERS], H, NUM_LABELS)
    params["wp"] = wp.astype(jnp.bfloat16)
    params["bp"] = bp.reshape(1, H)
    # classifier zero-padded to 128 output lanes -> lane-dense final store
    params["wc_pad"] = jnp.pad(wc, ((0, 0), (0, LANE - NUM_LABELS))).astype(jnp.bfloat16)
    params["bc_pad"] = jnp.pad(bc, (0, LANE - NUM_LABELS)).reshape(1, LANE)
    return params


# ----------------------------------------------------------------------------
# Forward pass (== SentimentModel.forward -> logits)
# ----------------------------------------------------------------------------
def sentiment_model_forward(params, input_ids, attention_mask):
    B, S = input_ids.shape
    D = HIDDEN
    scale = 1.0 / math.sqrt(HEAD_DIM)                  # static Python float

    # --- embeddings (gather = plain-JAX glue) + LayerNorm (Pallas, bf16 out) ---
    pos_ids = jnp.arange(S)
    emb = (params["word_emb"][input_ids]
           + params["pos_emb"][pos_ids][None, :, :]
           + params["type_emb"][0][None, None, :])     # token_type_ids default to 0
    x = pallas_embed_ln(emb.reshape(B * S, D),
                        params["emb_ln_g"], params["emb_ln_b"]).reshape(B, S, D)

    # additive attention bias precomputed once (fp32, compact (B,1,S))
    mask_bias = ((1.0 - attention_mask.astype(jnp.float32)) * -1e9).reshape(B, 1, S)

    # --- encoder: one fused pallas_call per layer, grid over batch ---
    for layer in params["layers"]:
        x = pallas_encoder_layer(x, mask_bias, layer, scale=scale, eps=EPS)

    # --- fused pooler (tanh on [CLS]) + classifier; slice lane-padded logits ---
    cls = x[:, 0, :]                                   # (B, D) bf16
    logits_pad = pallas_pooler_classifier(cls, params["wp"], params["bp"],
                                          params["wc_pad"], params["bc_pad"])
    return logits_pad[:, :NUM_LABELS]


# ----------------------------------------------------------------------------
if __name__ == "__main__":
    key = jax.random.PRNGKey(0)
    k_param, k_ids = jax.random.split(key)

    params = build_params(k_param)

    B, S = 2, 8
    input_ids = jax.random.randint(k_ids, (B, S), 0, VOCAB, dtype=jnp.int32)
    attention_mask = jnp.array(
        [[1, 1, 1, 1, 1, 1, 1, 1],
         [1, 1, 1, 1, 1, 0, 0, 0]], dtype=jnp.int32)

    logits = jax.jit(sentiment_model_forward)(params, input_ids, attention_mask)
    jax.block_until_ready(logits)
    assert logits.shape == (B, NUM_LABELS)
    print("KERNEL_OK")
</pallas_src>

<mosaic_0001>
module attributes {stable_mosaic.version = 11 : i64} {
  func.func @embed_ln_kernel(%arg0: i32, %arg1: memref<16x32xf32, #tpu.memory_space<vmem>>, %arg2: memref<1x32xf32, #tpu.memory_space<vmem>>, %arg3: memref<1x32xf32, #tpu.memory_space<vmem>>, %arg4: memref<16x32xbf16, #tpu.memory_space<vmem>>) attributes {dimension_semantics = [#tpu.dimension_semantics<arbitrary>], iteration_bounds = array<i64: 1>, scalar_prefetch = 0 : i64, scratch_operands = 0 : i64, tpu.core_type = #tpu.core_type<tc>, window_params = [{pipeline_mode = #tpu.pipeline_mode<synchronous>, transform_indices = @transform_0, window_bounds = array<i64: 16, 32>}, {pipeline_mode = #tpu.pipeline_mode<synchronous>, transform_indices = @transform_1, window_bounds = array<i64: 1, 32>}, {pipeline_mode = #tpu.pipeline_mode<synchronous>, transform_indices = @transform_2, window_bounds = array<i64: 1, 32>}, {pipeline_mode = #tpu.pipeline_mode<synchronous>, transform_indices = @transform_3, window_bounds = array<i64: 16, 32>}]} {
    %c0 = arith.constant 0 : index
    %c0_0 = arith.constant 0 : index
    %0 = vector.load %arg1[%c0, %c0_0] : memref<16x32xf32, #tpu.memory_space<vmem>>, vector<16x32xf32>
    %c0_1 = arith.constant 0 : index
    %c0_2 = arith.constant 0 : index
    %1 = vector.load %arg2[%c0_1, %c0_2] : memref<1x32xf32, #tpu.memory_space<vmem>>, vector<1x32xf32>
    %c0_3 = arith.constant 0 : index
    %c0_4 = arith.constant 0 : index
    %2 = vector.load %arg3[%c0_3, %c0_4] : memref<1x32xf32, #tpu.memory_space<vmem>>, vector<1x32xf32>
    %cst = arith.constant dense<0.000000e+00> : vector<16xf32>
    %3 = vector.multi_reduction <add>, %0, %cst [1] : vector<16x32xf32> to vector<16xf32>
    %4 = vector.shape_cast %3 : vector<16xf32> to vector<16x1xf32>
    %cst_5 = arith.constant 3.200000e+01 : f32
    %5 = vector.broadcast %cst_5 : f32 to vector<16x1xf32>
    %6 = arith.divf %4, %5 : vector<16x1xf32>
    %7 = vector.broadcast %6 : vector<16x1xf32> to vector<16x32xf32>
    %8 = arith.subf %0, %7 : vector<16x32xf32>
    %9 = vector.broadcast %6 : vector<16x1xf32> to vector<16x32xf32>
    %10 = arith.subf %0, %9 : vector<16x32xf32>
    %11 = arith.mulf %8, %10 : vector<16x32xf32>
    %cst_6 = arith.constant dense<0.000000e+00> : vector<16xf32>
    %12 = vector.multi_reduction <add>, %11, %cst_6 [1] : vector<16x32xf32> to vector<16xf32>
    %13 = vector.shape_cast %12 : vector<16xf32> to vector<16x1xf32>
    %cst_7 = arith.constant 3.200000e+01 : f32
    %14 = vector.broadcast %cst_7 : f32 to vector<16x1xf32>
    %15 = arith.divf %13, %14 : vector<16x1xf32>
    %16 = vector.broadcast %6 : vector<16x1xf32> to vector<16x32xf32>
    %17 = arith.subf %0, %16 : vector<16x32xf32>
    %cst_8 = arith.constant 9.99999996E-13 : f32
    %18 = vector.broadcast %cst_8 : f32 to vector<16x1xf32>
    %19 = arith.addf %15, %18 : vector<16x1xf32>
    %20 = math.rsqrt %19 : vector<16x1xf32>
    %21 = vector.broadcast %20 : vector<16x1xf32> to vector<16x32xf32>
    %22 = arith.mulf %17, %21 : vector<16x32xf32>
    %23 = vector.broadcast %1 : vector<1x32xf32> to vector<16x32xf32>
    %24 = arith.mulf %22, %23 : vector<16x32xf32>
    %25 = vector.broadcast %2 : vector<1x32xf32> to vector<16x32xf32>
    %26 = arith.addf %24, %25 : vector<16x32xf32>
    %27 = arith.truncf %26 : vector<16x32xf32> to vector<16x32xbf16>
    %c0_9 = arith.constant 0 : index
    %c0_10 = arith.constant 0 : index
    %28 = vector.load %arg4[%c0_9, %c0_10] : memref<16x32xbf16, #tpu.memory_space<vmem>>, vector<16x32xbf16>
    tpu.vector_store %arg4[%c0_9, %c0_10], %27 {strides = array<i32>} : memref<16x32xbf16, #tpu.memory_space<vmem>>, vector<16x32xbf16>,
    return
  }
  func.func @transform_0(%arg0: i32) -> (i32, i32) {
    %c0_i32 = arith.constant 0 : i32
    %c0_i32_0 = arith.constant 0 : i32
    %c0_i32_1 = arith.constant 0 : i32
    return %c0_i32, %c0_i32_0 : i32, i32
  }
  func.func @transform_1(%arg0: i32) -> (i32, i32) {
    %c0_i32 = arith.constant 0 : i32
    %c0_i32_0 = arith.constant 0 : i32
    %c0_i32_1 = arith.constant 0 : i32
    return %c0_i32, %c0_i32_0 : i32, i32
  }
  func.func @transform_2(%arg0: i32) -> (i32, i32) {
    %c0_i32 = arith.constant 0 : i32
    %c0_i32_0 = arith.constant 0 : i32
    %c0_i32_1 = arith.constant 0 : i32
    return %c0_i32, %c0_i32_0 : i32, i32
  }
  func.func @transform_3(%arg0: i32) -> (i32, i32) {
    %c0_i32 = arith.constant 0 : i32
    %c0_i32_0 = arith.constant 0 : i32
    %c0_i32_1 = arith.constant 0 : i32
    return %c0_i32, %c0_i32_0 : i32, i32
  }
}

module attributes {stable_mosaic.version = 11 : i64} {
  func.func @encoder_layer_kernel(%arg0: i32, %arg1: memref<1x8x32xbf16, #tpu.memory_space<vmem>>, %arg2: memref<1x1x8xf32, #tpu.memory_space<vmem>>, %arg3: memref<32x96xbf16, #tpu.memory_space<vmem>>, %arg4: memref<1x96xf32, #tpu.memory_space<vmem>>, %arg5: memref<32x32xbf16, #tpu.memory_space<vmem>>, %arg6: memref<1x32xf32, #tpu.memory_space<vmem>>, %arg7: memref<1x32xf32, #tpu.memory_space<vmem>>, %arg8: memref<1x32xf32, #tpu.memory_space<vmem>>, %arg9: memref<32x64xbf16, #tpu.memory_space<vmem>>, %arg10: memref<1x64xf32, #tpu.memory_space<vmem>>, %arg11: memref<64x32xbf16, #tpu.memory_space<vmem>>, %arg12: memref<1x32xf32, #tpu.memory_space<vmem>>, %arg13: memref<1x32xf32, #tpu.memory_space<vmem>>, %arg14: memref<1x32xf32, #tpu.memory_space<vmem>>, %arg15: memref<1x8x32xbf16, #tpu.memory_space<vmem>>) attributes {dimension_semantics = [#tpu.dimension_semantics<parallel>], iteration_bounds = array<i64: 2>, scalar_prefetch = 0 : i64, scratch_operands = 0 : i64, tpu.core_type = #tpu.core_type<tc>, window_params = [{transform_indices = @transform_0, window_bounds = array<i64: 1, 8, 32>}, {transform_indices = @transform_1, window_bounds = array<i64: 1, 1, 8>}, {pipeline_mode = #tpu.pipeline_mode<synchronous>, transform_indices = @transform_2, window_bounds = array<i64: 32, 96>}, {pipeline_mode = #tpu.pipeline_mode<synchronous>, transform_indices = @transform_3, window_bounds = array<i64: 1, 96>}, {pipeline_mode = #tpu.pipeline_mode<synchronous>, transform_indices = @transform_4, window_bounds = array<i64: 32, 32>}, {pipeline_mode = #tpu.pipeline_mode<synchronous>, transform_indices = @transform_5, window_bounds = array<i64: 1, 32>}, {pipeline_mode = #tpu.pipeline_mode<synchronous>, transform_indices = @transform_6, window_bounds = array<i64: 1, 32>}, {pipeline_mode = #tpu.pipeline_mode<synchronous>, transform_indices = @transform_7, window_bounds = array<i64: 1, 32>}, {pipeline_mode = #tpu.pipeline_mode<synchronous>, transform_indices = @transform_8, window_bounds = array<i64: 32, 64>}, {pipeline_mode = #tpu.pipeline_mode<synchronous>, transform_indices = @transform_9, window_bounds = array<i64: 1, 64>}, {pipeline_mode = #tpu.pipeline_mode<synchronous>, transform_indices = @transform_10, window_bounds = array<i64: 64, 32>}, {pipeline_mode = #tpu.pipeline_mode<synchronous>, transform_indices = @transform_11, window_bounds = array<i64: 1, 32>}, {pipeline_mode = #tpu.pipeline_mode<synchronous>, transform_indices = @transform_12, window_bounds = array<i64: 1, 32>}, {pipeline_mode = #tpu.pipeline_mode<synchronous>, transform_indices = @transform_13, window_bounds = array<i64: 1, 32>}, {transform_indices = @transform_14, window_bounds = array<i64: 1, 8, 32>}]} {
    %c0 = arith.constant 0 : index
    %c0_0 = arith.constant 0 : index
    %c0_1 = arith.constant 0 : index
    %0 = vector.load %arg1[%c0, %c0_0, %c0_1] : memref<1x8x32xbf16, #tpu.memory_space<vmem>>, vector<1x8x32xbf16>
    %1 = vector.shape_cast %0 : vector<1x8x32xbf16> to vector<8x32xbf16>
    %2 = arith.extf %1 : vector<8x32xbf16> to vector<8x32xf32>
    %c0_2 = arith.constant 0 : index
    %c0_3 = arith.constant 0 : index
    %c0_4 = arith.constant 0 : index
    %3 = vector.load %arg2[%c0_2, %c0_3, %c0_4] : memref<1x1x8xf32, #tpu.memory_space<vmem>>, vector<1x1x8xf32>
    %4 = vector.shape_cast %3 : vector<1x1x8xf32> to vector<1x8xf32>
    %c0_5 = arith.constant 0 : index
    %c0_6 = arith.constant 0 : index
    %5 = vector.load %arg3[%c0_5, %c0_6] : memref<32x96xbf16, #tpu.memory_space<vmem>>, vector<32x96xbf16>
    %cst = arith.constant dense<0.000000e+00> : vector<8x96xf32>
    %6 = tpu.matmul %1, %5, %cst {dimension_numbers = #tpu.dot_dimension_numbers<[1], [0], [0], [1], [0, 0, 1, 1], [], []>} : vector<8x32xbf16>, vector<32x96xbf16>, vector<8x96xf32> -> vector<8x96xf32>
    %c0_7 = arith.constant 0 : index
    %c0_8 = arith.constant 0 : index
    %7 = vector.load %arg4[%c0_7, %c0_8] : memref<1x96xf32, #tpu.memory_space<vmem>>, vector<1x96xf32>
    %8 = vector.broadcast %7 : vector<1x96xf32> to vector<8x96xf32>
    %9 = arith.addf %6, %8 : vector<8x96xf32>
    %10 = vector.extract_strided_slice %9 {offsets = [0, 0], sizes = [8, 8], strides = [1, 1]} : vector<8x96xf32> to vector<8x8xf32>
    %cst_9 = arith.constant 0.353553385 : f32
    %11 = vector.broadcast %cst_9 : f32 to vector<8x8xf32>
    %12 = arith.mulf %10, %11 : vector<8x8xf32>
    %13 = vector.extract_strided_slice %9 {offsets = [0, 32], sizes = [8, 8], strides = [1, 1]} : vector<8x96xf32> to vector<8x8xf32>
    %14 = vector.extract_strided_slice %9 {offsets = [0, 64], sizes = [8, 8], strides = [1, 1]} : vector<8x96xf32> to vector<8x8xf32>
    %15 = arith.truncf %12 : vector<8x8xf32> to vector<8x8xbf16>
    %16 = arith.truncf %13 : vector<8x8xf32> to vector<8x8xbf16>
    %cst_10 = arith.constant dense<0.000000e+00> : vector<8x8xf32>
    %17 = tpu.matmul %15, %16, %cst_10 {dimension_numbers = #tpu.dot_dimension_numbers<[1], [1], [0], [0], [0, 0, 1, 0], [], []>} : vector<8x8xbf16>, vector<8x8xbf16>, vector<8x8xf32> -> vector<8x8xf32>
    %18 = vector.broadcast %4 : vector<1x8xf32> to vector<8x8xf32>
    %19 = arith.addf %17, %18 : vector<8x8xf32>
    %cst_11 = arith.constant dense<0xFF800000> : vector<8xf32>
    %20 = vector.multi_reduction <maximumf>, %19, %cst_11 [1] : vector<8x8xf32> to vector<8xf32>
    %21 = vector.shape_cast %20 : vector<8xf32> to vector<8x1xf32>
    %22 = vector.broadcast %21 : vector<8x1xf32> to vector<8x8xf32>
    %23 = arith.subf %19, %22 : vector<8x8xf32>
    %24 = math.exp %23 : vector<8x8xf32>
    %cst_12 = arith.constant dense<0.000000e+00> : vector<8xf32>
    %25 = vector.multi_reduction <add>, %24, %cst_12 [1] : vector<8x8xf32> to vector<8xf32>
    %26 = vector.shape_cast %25 : vector<8xf32> to vector<8x1xf32>
    %27 = tpu.reciprocal %26 {approx = true} : vector<8x1xf32> -> vector<8x1xf32>
    %28 = vector.broadcast %27 : vector<8x1xf32> to vector<8x8xf32>
    %29 = arith.mulf %24, %28 : vector<8x8xf32>
    %30 = arith.truncf %29 : vector<8x8xf32> to vector<8x8xbf16>
    %31 = arith.truncf %14 : vector<8x8xf32> to vector<8x8xbf16>
    %cst_13 = arith.constant dense<0.000000e+00> : vector<8x8xf32>
    %32 = tpu.matmul %30, %31, %cst_13 {dimension_numbers = #tpu.dot_dimension_numbers<[1], [0], [0], [1], [0, 0, 1, 1], [], []>} : vector<8x8xbf16>, vector<8x8xbf16>, vector<8x8xf32> -> vector<8x8xf32>
    %33 = vector.extract_strided_slice %9 {offsets = [0, 8], sizes = [8, 8], strides = [1, 1]} : vector<8x96xf32> to vector<8x8xf32>
    %cst_14 = arith.constant 0.353553385 : f32
    %34 = vector.broadcast %cst_14 : f32 to vector<8x8xf32>
    %35 = arith.mulf %33, %34 : vector<8x8xf32>
    %36 = vector.extract_strided_slice %9 {offsets = [0, 40], sizes = [8, 8], strides = [1, 1]} : vector<8x96xf32> to vector<8x8xf32>
    %37 = vector.extract_strided_slice %9 {offsets = [0, 72], sizes = [8, 8], strides = [1, 1]} : vector<8x96xf32> to vector<8x8xf32>
    %38 = arith.truncf %35 : vector<8x8xf32> to vector<8x8xbf16>
    %39 = arith.truncf %36 : vector<8x8xf32> to vector<8x8xbf16>
    %cst_15 = arith.constant dense<0.000000e+00> : vector<8x8xf32>
    %40 = tpu.matmul %38, %39, %cst_15 {dimension_numbers = #tpu.dot_dimension_numbers<[1], [1], [0], [0], [0, 0, 1, 0], [], []>} : vector<8x8xbf16>, vector<8x8xbf16>, vector<8x8xf32> -> vector<8x8xf32>
    %41 = vector.broadcast %4 : vector<1x8xf32> to vector<8x8xf32>
    %42 = arith.addf %40, %41 : vector<8x8xf32>
    %cst_16 = arith.constant dense<0xFF800000> : vector<8xf32>
    %43 = vector.multi_reduction <maximumf>, %42, %cst_16 [1] : vector<8x8xf32> to vector<8xf32>
    %44 = vector.shape_cast %43 : vector<8xf32> to vector<8x1xf32>
    %45 = vector.broadcast %44 : vector<8x1xf32> to vector<8x8xf32>
    %46 = arith.subf %42, %45 : vector<8x8xf32>
    %47 = math.exp %46 : vector<8x8xf32>
    %cst_17 = arith.constant dense<0.000000e+00> : vector<8xf32>
    %48 = vector.multi_reduction <add>, %47, %cst_17 [1] : vector<8x8xf32> to vector<8xf32>
    %49 = vector.shape_cast %48 : vector<8xf32> to vector<8x1xf32>
    %50 = tpu.reciprocal %49 {approx = true} : vector<8x1xf32> -> vector<8x1xf32>
    %51 = vector.broadcast %50 : vector<8x1xf32> to vector<8x8xf32>
    %52 = arith.mulf %47, %51 : vector<8x8xf32>
    %53 = arith.truncf %52 : vector<8x8xf32> to vector<8x8xbf16>
    %54 = arith.truncf %37 : vector<8x8xf32> to vector<8x8xbf16>
    %cst_18 = arith.constant dense<0.000000e+00> : vector<8x8xf32>
    %55 = tpu.matmul %53, %54, %cst_18 {dimension_numbers = #tpu.dot_dimension_numbers<[1], [0], [0], [1], [0, 0, 1, 1], [], []>} : vector<8x8xbf16>, vector<8x8xbf16>, vector<8x8xf32> -> vector<8x8xf32>
    %56 = vector.extract_strided_slice %9 {offsets = [0, 16], sizes = [8, 8], strides = [1, 1]} : vector<8x96xf32> to vector<8x8xf32>
    %cst_19 = arith.constant 0.353553385 : f32
    %57 = vector.broadcast %cst_19 : f32 to vector<8x8xf32>
    %58 = arith.mulf %56, %57 : vector<8x8xf32>
    %59 = vector.extract_strided_slice %9 {offsets = [0, 48], sizes = [8, 8], strides = [1, 1]} : vector<8x96xf32> to vector<8x8xf32>
    %60 = vector.extract_strided_slice %9 {offsets = [0, 80], sizes = [8, 8], strides = [1, 1]} : vector<8x96xf32> to vector<8x8xf32>
    %61 = arith.truncf %58 : vector<8x8xf32> to vector<8x8xbf16>
    %62 = arith.truncf %59 : vector<8x8xf32> to vector<8x8xbf16>
    %cst_20 = arith.constant dense<0.000000e+00> : vector<8x8xf32>
    %63 = tpu.matmul %61, %62, %cst_20 {dimension_numbers = #tpu.dot_dimension_numbers<[1], [1], [0], [0], [0, 0, 1, 0], [], []>} : vector<8x8xbf16>, vector<8x8xbf16>, vector<8x8xf32> -> vector<8x8xf32>
    %64 = vector.broadcast %4 : vector<1x8xf32> to vector<8x8xf32>
    %65 = arith.addf %63, %64 : vector<8x8xf32>
    %cst_21 = arith.constant dense<0xFF800000> : vector<8xf32>
    %66 = vector.multi_reduction <maximumf>, %65, %cst_21 [1] : vector<8x8xf32> to vector<8xf32>
    %67 = vector.shape_cast %66 : vector<8xf32> to vector<8x1xf32>
    %68 = vector.broadcast %67 : vector<8x1xf32> to vector<8x8xf32>
    %69 = arith.subf %65, %68 : vector<8x8xf32>
    %70 = math.exp %69 : vector<8x8xf32>
    %cst_22 = arith.constant dense<0.000000e+00> : vector<8xf32>
    %71 = vector.multi_reduction <add>, %70, %cst_22 [1] : vector<8x8xf32> to vector<8xf32>
    %72 = vector.shape_cast %71 : vector<8xf32> to vector<8x1xf32>
    %73 = tpu.reciprocal %72 {approx = true} : vector<8x1xf32> -> vector<8x1xf32>
    %74 = vector.broadcast %73 : vector<8x1xf32> to vector<8x8xf32>
    %75 = arith.mulf %70, %74 : vector<8x8xf32>
    %76 = arith.truncf %75 : vector<8x8xf32> to vector<8x8xbf16>
    %77 = arith.truncf %60 : vector<8x8xf32> to vector<8x8xbf16>
    %cst_23 = arith.constant dense<0.000000e+00> : vector<8x8xf32>
    %78 = tpu.matmul %76, %77, %cst_23 {dimension_numbers = #tpu.dot_dimension_numbers<[1], [0], [0], [1], [0, 0, 1, 1], [], []>} : vector<8x8xbf16>, vector<8x8xbf16>, vector<8x8xf32> -> vector<8x8xf32>
    %79 = vector.extract_strided_slice %9 {offsets = [0, 24], sizes = [8, 8], strides = [1, 1]} : vector<8x96xf32> to vector<8x8xf32>
    %cst_24 = arith.constant 0.353553385 : f32
    %80 = vector.broadcast %cst_24 : f32 to vector<8x8xf32>
    %81 = arith.mulf %79, %80 : vector<8x8xf32>
    %82 = vector.extract_strided_slice %9 {offsets = [0, 56], sizes = [8, 8], strides = [1, 1]} : vector<8x96xf32> to vector<8x8xf32>
    %83 = vector.extract_strided_slice %9 {offsets = [0, 88], sizes = [8, 8], strides = [1, 1]} : vector<8x96xf32> to vector<8x8xf32>
    %84 = arith.truncf %81 : vector<8x8xf32> to vector<8x8xbf16>
    %85 = arith.truncf %82 : vector<8x8xf32> to vector<8x8xbf16>
    %cst_25 = arith.constant dense<0.000000e+00> : vector<8x8xf32>
    %86 = tpu.matmul %84, %85, %cst_25 {dimension_numbers = #tpu.dot_dimension_numbers<[1], [1], [0], [0], [0, 0, 1, 0], [], []>} : vector<8x8xbf16>, vector<8x8xbf16>, vector<8x8xf32> -> vector<8x8xf32>
    %87 = vector.broadcast %4 : vector<1x8xf32> to vector<8x8xf32>
    %88 = arith.addf %86, %87 : vector<8x8xf32>
    %cst_26 = arith.constant dense<0xFF800000> : vector<8xf32>
    %89 = vector.multi_reduction <maximumf>, %88, %cst_26 [1] : vector<8x8xf32> to vector<8xf32>
    %90 = vector.shape_cast %89 : vector<8xf32> to vector<8x1xf32>
    %91 = vector.broadcast %90 : vector<8x1xf32> to vector<8x8xf32>
    %92 = arith.subf %88, %91 : vector<8x8xf32>
    %93 = math.exp %92 : vector<8x8xf32>
    %cst_27 = arith.constant dense<0.000000e+00> : vector<8xf32>
    %94 = vector.multi_reduction <add>, %93, %cst_27 [1] : vector<8x8xf32> to vector<8xf32>
    %95 = vector.shape_cast %94 : vector<8xf32> to vector<8x1xf32>
    %96 = tpu.reciprocal %95 {approx = true} : vector<8x1xf32> -> vector<8x1xf32>
    %97 = vector.broadcast %96 : vector<8x1xf32> to vector<8x8xf32>
    %98 = arith.mulf %93, %97 : vector<8x8xf32>
    %99 = arith.truncf %98 : vector<8x8xf32> to vector<8x8xbf16>
    %100 = arith.truncf %83 : vector<8x8xf32> to vector<8x8xbf16>
    %cst_28 = arith.constant dense<0.000000e+00> : vector<8x8xf32>
    %101 = tpu.matmul %99, %100, %cst_28 {dimension_numbers = #tpu.dot_dimension_numbers<[1], [0], [0], [1], [0, 0, 1, 1], [], []>} : vector<8x8xbf16>, vector<8x8xbf16>, vector<8x8xf32> -> vector<8x8xf32>
    %102 = tpu.concatenate %32, %55, %78, %101 in 1 : vector<8x8xf32>, vector<8x8xf32>, vector<8x8xf32>, vector<8x8xf32> -> vector<8x32xf32>
    %103 = arith.truncf %102 : vector<8x32xf32> to vector<8x32xbf16>
    %c0_29 = arith.constant 0 : index
    %c0_30 = arith.constant 0 : index
    %104 = vector.load %arg5[%c0_29, %c0_30] : memref<32x32xbf16, #tpu.memory_space<vmem>>, vector<32x32xbf16>
    %cst_31 = arith.constant dense<0.000000e+00> : vector<8x32xf32>
    %105 = tpu.matmul %103, %104, %cst_31 {dimension_numbers = #tpu.dot_dimension_numbers<[1], [0], [0], [1], [0, 0, 1, 1], [], []>} : vector<8x32xbf16>, vector<32x32xbf16>, vector<8x32xf32> -> vector<8x32xf32>
    %c0_32 = arith.constant 0 : index
    %c0_33 = arith.constant 0 : index
    %106 = vector.load %arg6[%c0_32, %c0_33] : memref<1x32xf32, #tpu.memory_space<vmem>>, vector<1x32xf32>
    %107 = vector.broadcast %106 : vector<1x32xf32> to vector<8x32xf32>
    %108 = arith.addf %105, %107 : vector<8x32xf32>
    %109 = arith.addf %108, %2 : vector<8x32xf32>
    %c0_34 = arith.constant 0 : index
    %c0_35 = arith.constant 0 : index
    %110 = vector.load %arg7[%c0_34, %c0_35] : memref<1x32xf32, #tpu.memory_space<vmem>>, vector<1x32xf32>
    %c0_36 = arith.constant 0 : index
    %c0_37 = arith.constant 0 : index
    %111 = vector.load %arg8[%c0_36, %c0_37] : memref<1x32xf32, #tpu.memory_space<vmem>>, vector<1x32xf32>
    %cst_38 = arith.constant dense<0.000000e+00> : vector<8xf32>
    %112 = vector.multi_reduction <add>, %109, %cst_38 [1] : vector<8x32xf32> to vector<8xf32>
    %113 = vector.shape_cast %112 : vector<8xf32> to vector<8x1xf32>
    %cst_39 = arith.constant 3.200000e+01 : f32
    %114 = vector.broadcast %cst_39 : f32 to vector<8x1xf32>
    %115 = arith.divf %113, %114 : vector<8x1xf32>
    %116 = vector.broadcast %115 : vector<8x1xf32> to vector<8x32xf32>
    %117 = arith.subf %109, %116 : vector<8x32xf32>
    %118 = vector.broadcast %115 : vector<8x1xf32> to vector<8x32xf32>
    %119 = arith.subf %109, %118 : vector<8x32xf32>
    %120 = arith.mulf %117, %119 : vector<8x32xf32>
    %cst_40 = arith.constant dense<0.000000e+00> : vector<8xf32>
    %121 = vector.multi_reduction <add>, %120, %cst_40 [1] : vector<8x32xf32> to vector<8xf32>
    %122 = vector.shape_cast %121 : vector<8xf32> to vector<8x1xf32>
    %cst_41 = arith.constant 3.200000e+01 : f32
    %123 = vector.broadcast %cst_41 : f32 to vector<8x1xf32>
    %124 = arith.divf %122, %123 : vector<8x1xf32>
    %125 = vector.broadcast %115 : vector<8x1xf32> to vector<8x32xf32>
    %126 = arith.subf %109, %125 : vector<8x32xf32>
    %cst_42 = arith.constant 9.99999996E-13 : f32
    %127 = vector.broadcast %cst_42 : f32 to vector<8x1xf32>
    %128 = arith.addf %124, %127 : vector<8x1xf32>
    %129 = math.rsqrt %128 : vector<8x1xf32>
    %130 = vector.broadcast %129 : vector<8x1xf32> to vector<8x32xf32>
    %131 = arith.mulf %126, %130 : vector<8x32xf32>
    %132 = vector.broadcast %110 : vector<1x32xf32> to vector<8x32xf32>
    %133 = arith.mulf %131, %132 : vector<8x32xf32>
    %134 = vector.broadcast %111 : vector<1x32xf32> to vector<8x32xf32>
    %135 = arith.addf %133, %134 : vector<8x32xf32>
    %136 = arith.truncf %135 : vector<8x32xf32> to vector<8x32xbf16>
    %c0_43 = arith.constant 0 : index
    %c0_44 = arith.constant 0 : index
    %137 = vector.load %arg9[%c0_43, %c0_44] : memref<32x64xbf16, #tpu.memory_space<vmem>>, vector<32x64xbf16>
    %cst_45 = arith.constant dense<0.000000e+00> : vector<8x64xf32>
    %138 = tpu.matmul %136, %137, %cst_45 {dimension_numbers = #tpu.dot_dimension_numbers<[1], [0], [0], [1], [0, 0, 1, 1], [], []>} : vector<8x32xbf16>, vector<32x64xbf16>, vector<8x64xf32> -> vector<8x64xf32>
    %c0_46 = arith.constant 0 : index
    %c0_47 = arith.constant 0 : index
    %139 = vector.load %arg10[%c0_46, %c0_47] : memref<1x64xf32, #tpu.memory_space<vmem>>, vector<1x64xf32>
    %140 = vector.broadcast %139 : vector<1x64xf32> to vector<8x64xf32>
    %141 = arith.addf %138, %140 : vector<8x64xf32>
    %cst_48 = arith.constant 5.000000e-01 : f32
    %142 = vector.broadcast %cst_48 : f32 to vector<8x64xf32>
    %143 = arith.mulf %142, %141 : vector<8x64xf32>
    %cst_49 = arith.constant 4.471500e-02 : f32
    %144 = vector.broadcast %cst_49 : f32 to vector<8x64xf32>
    %145 = arith.mulf %144, %141 : vector<8x64xf32>
    %146 = arith.mulf %145, %141 : vector<8x64xf32>
    %147 = arith.mulf %146, %141 : vector<8x64xf32>
    %148 = arith.addf %141, %147 : vector<8x64xf32>
    %cst_50 = arith.constant 0.797884583 : f32
    %149 = vector.broadcast %cst_50 : f32 to vector<8x64xf32>
    %150 = arith.mulf %149, %148 : vector<8x64xf32>
    %151 = math.tanh %150 : vector<8x64xf32>
    %cst_51 = arith.constant 1.000000e+00 : f32
    %152 = vector.broadcast %cst_51 : f32 to vector<8x64xf32>
    %153 = arith.addf %152, %151 : vector<8x64xf32>
    %154 = arith.mulf %143, %153 : vector<8x64xf32>
    %155 = arith.truncf %154 : vector<8x64xf32> to vector<8x64xbf16>
    %c0_52 = arith.constant 0 : index
    %c0_53 = arith.constant 0 : index
    %156 = vector.load %arg11[%c0_52, %c0_53] : memref<64x32xbf16, #tpu.memory_space<vmem>>, vector<64x32xbf16>
    %cst_54 = arith.constant dense<0.000000e+00> : vector<8x32xf32>
    %157 = tpu.matmul %155, %156, %cst_54 {dimension_numbers = #tpu.dot_dimension_numbers<[1], [0], [0], [1], [0, 0, 1, 1], [], []>} : vector<8x64xbf16>, vector<64x32xbf16>, vector<8x32xf32> -> vector<8x32xf32>
    %c0_55 = arith.constant 0 : index
    %c0_56 = arith.constant 0 : index
    %158 = vector.load %arg12[%c0_55, %c0_56] : memref<1x32xf32, #tpu.memory_space<vmem>>, vector<1x32xf32>
    %159 = vector.broadcast %158 : vector<1x32xf32> to vector<8x32xf32>
    %160 = arith.addf %157, %159 : vector<8x32xf32>
    %161 = arith.addf %160, %135 : vector<8x32xf32>
    %c0_57 = arith.constant 0 : index
    %c0_58 = arith.constant 0 : index
    %162 = vector.load %arg13[%c0_57, %c0_58] : memref<1x32xf32, #tpu.memory_space<vmem>>, vector<1x32xf32>
    %c0_59 = arith.constant 0 : index
    %c0_60 = arith.constant 0 : index
    %163 = vector.load %arg14[%c0_59, %c0_60] : memref<1x32xf32, #tpu.memory_space<vmem>>, vector<1x32xf32>
    %cst_61 = arith.constant dense<0.000000e+00> : vector<8xf32>
    %164 = vector.multi_reduction <add>, %161, %cst_61 [1] : vector<8x32xf32> to vector<8xf32>
    %165 = vector.shape_cast %164 : vector<8xf32> to vector<8x1xf32>
    %cst_62 = arith.constant 3.200000e+01 : f32
    %166 = vector.broadcast %cst_62 : f32 to vector<8x1xf32>
    %167 = arith.divf %165, %166 : vector<8x1xf32>
    %168 = vector.broadcast %167 : vector<8x1xf32> to vector<8x32xf32>
    %169 = arith.subf %161, %168 : vector<8x32xf32>
    %170 = vector.broadcast %167 : vector<8x1xf32> to vector<8x32xf32>
    %171 = arith.subf %161, %170 : vector<8x32xf32>
    %172 = arith.mulf %169, %171 : vector<8x32xf32>
    %cst_63 = arith.constant dense<0.000000e+00> : vector<8xf32>
    %173 = vector.multi_reduction <add>, %172, %cst_63 [1] : vector<8x32xf32> to vector<8xf32>
    %174 = vector.shape_cast %173 : vector<8xf32> to vector<8x1xf32>
    %cst_64 = arith.constant 3.200000e+01 : f32
    %175 = vector.broadcast %cst_64 : f32 to vector<8x1xf32>
    %176 = arith.divf %174, %175 : vector<8x1xf32>
    %177 = vector.broadcast %167 : vector<8x1xf32> to vector<8x32xf32>
    %178 = arith.subf %161, %177 : vector<8x32xf32>
    %cst_65 = arith.constant 9.99999996E-13 : f32
    %179 = vector.broadcast %cst_65 : f32 to vector<8x1xf32>
    %180 = arith.addf %176, %179 : vector<8x1xf32>
    %181 = math.rsqrt %180 : vector<8x1xf32>
    %182 = vector.broadcast %181 : vector<8x1xf32> to vector<8x32xf32>
    %183 = arith.mulf %178, %182 : vector<8x32xf32>
    %184 = vector.broadcast %162 : vector<1x32xf32> to vector<8x32xf32>
    %185 = arith.mulf %183, %184 : vector<8x32xf32>
    %186 = vector.broadcast %163 : vector<1x32xf32> to vector<8x32xf32>
    %187 = arith.addf %185, %186 : vector<8x32xf32>
    %188 = arith.truncf %187 : vector<8x32xf32> to vector<8x32xbf16>
    %c0_66 = arith.constant 0 : index
    %c0_67 = arith.constant 0 : index
    %c0_68 = arith.constant 0 : index
    %189 = vector.load %arg15[%c0_66, %c0_67, %c0_68] : memref<1x8x32xbf16, #tpu.memory_space<vmem>>, vector<1x8x32xbf16>
    %190 = vector.shape_cast %189 : vector<1x8x32xbf16> to vector<8x32xbf16>
    %191 = vector.shape_cast %188 : vector<8x32xbf16> to vector<1x8x32xbf16>
    tpu.vector_store %arg15[%c0_66, %c0_67, %c0_68], %191 {strides = array<i32>} : memref<1x8x32xbf16, #tpu.memory_space<vmem>>, vector<1x8x32xbf16>,
    return
  }
  func.func @transform_0(%arg0: i32) -> (i32, i32, i32) {
    %c0_i32 = arith.constant 0 : i32
    %c0_i32_0 = arith.constant 0 : i32
    %c0_i32_1 = arith.constant 0 : i32
    return %arg0, %c0_i32, %c0_i32_0 : i32, i32, i32
  }
  func.func @transform_1(%arg0: i32) -> (i32, i32, i32) {
    %c0_i32 = arith.constant 0 : i32
    %c0_i32_0 = arith.constant 0 : i32
    %c0_i32_1 = arith.constant 0 : i32
    return %arg0, %c0_i32, %c0_i32_0 : i32, i32, i32
  }
  func.func @transform_2(%arg0: i32) -> (i32, i32) {
    %c0_i32 = arith.constant 0 : i32
    %c0_i32_0 = arith.constant 0 : i32
    %c0_i32_1 = arith.constant 0 : i32
    return %c0_i32, %c0_i32_0 : i32, i32
  }
  func.func @transform_3(%arg0: i32) -> (i32, i32) {
    %c0_i32 = arith.constant 0 : i32
    %c0_i32_0 = arith.constant 0 : i32
    %c0_i32_1 = arith.constant 0 : i32
    return %c0_i32, %c0_i32_0 : i32, i32
  }
  func.func @transform_4(%arg0: i32) -> (i32, i32) {
    %c0_i32 = arith.constant 0 : i32
    %c0_i32_0 = arith.constant 0 : i32
    %c0_i32_1 = arith.constant 0 : i32
    return %c0_i32, %c0_i32_0 : i32, i32
  }
  func.func @transform_5(%arg0: i32) -> (i32, i32) {
    %c0_i32 = arith.constant 0 : i32
    %c0_i32_0 = arith.constant 0 : i32
    %c0_i32_1 = arith.constant 0 : i32
    return %c0_i32, %c0_i32_0 : i32, i32
  }
  func.func @transform_6(%arg0: i32) -> (i32, i32) {
    %c0_i32 = arith.constant 0 : i32
    %c0_i32_0 = arith.constant 0 : i32
    %c0_i32_1 = arith.constant 0 : i32
    return %c0_i32, %c0_i32_0 : i32, i32
  }
  func.func @transform_7(%arg0: i32) -> (i32, i32) {
    %c0_i32 = arith.constant 0 : i32
    %c0_i32_0 = arith.constant 0 : i32
    %c0_i32_1 = arith.constant 0 : i32
    return %c0_i32, %c0_i32_0 : i32, i32
  }
  func.func @transform_8(%arg0: i32) -> (i32, i32) {
    %c0_i32 = arith.constant 0 : i32
    %c0_i32_0 = arith.constant 0 : i32
    %c0_i32_1 = arith.constant 0 : i32
    return %c0_i32, %c0_i32_0 : i32, i32
  }
  func.func @transform_9(%arg0: i32) -> (i32, i32) {
    %c0_i32 = arith.constant 0 : i32
    %c0_i32_0 = arith.constant 0 : i32
    %c0_i32_1 = arith.constant 0 : i32
    return %c0_i32, %c0_i32_0 : i32, i32
  }
  func.func @transform_10(%arg0: i32) -> (i32, i32) {
    %c0_i32 = arith.constant 0 : i32
    %c0_i32_0 = arith.constant 0 : i32
    %c0_i32_1 = arith.constant 0 : i32
    return %c0_i32, %c0_i32_0 : i32, i32
  }
  func.func @transform_11(%arg0: i32) -> (i32, i32) {
    %c0_i32 = arith.constant 0 : i32
    %c0_i32_0 = arith.constant 0 : i32
    %c0_i32_1 = arith.constant 0 : i32
    return %c0_i32, %c0_i32_0 : i32, i32
  }
  func.func @transform_12(%arg0: i32) -> (i32, i32) {
    %c0_i32 = arith.constant 0 : i32
    %c0_i32_0 = arith.constant 0 : i32
    %c0_i32_1 = arith.constant 0 : i32
    return %c0_i32, %c0_i32_0 : i32, i32
  }
  func.func @transform_13(%arg0: i32) -> (i32, i32) {
    %c0_i32 = arith.constant 0 : i32
    %c0_i32_0 = arith.constant 0 : i32
    %c0_i32_1 = arith.constant 0 : i32
    return %c0_i32, %c0_i32_0 : i32, i32
  }
  func.func @transform_14(%arg0: i32) -> (i32, i32, i32) {
    %c0_i32 = arith.constant 0 : i32
    %c0_i32_0 = arith.constant 0 : i32
    %c0_i32_1 = arith.constant 0 : i32
    return %arg0, %c0_i32, %c0_i32_0 : i32, i32, i32
  }
}

module attributes {stable_mosaic.version = 11 : i64} {
  func.func @pooler_classifier_kernel(%arg0: i32, %arg1: memref<2x32xbf16, #tpu.memory_space<vmem>>, %arg2: memref<32x32xbf16, #tpu.memory_space<vmem>>, %arg3: memref<1x32xf32, #tpu.memory_space<vmem>>, %arg4: memref<32x128xbf16, #tpu.memory_space<vmem>>, %arg5: memref<1x128xf32, #tpu.memory_space<vmem>>, %arg6: memref<2x128xf32, #tpu.memory_space<vmem>>) attributes {dimension_semantics = [#tpu.dimension_semantics<arbitrary>], iteration_bounds = array<i64: 1>, scalar_prefetch = 0 : i64, scratch_operands = 0 : i64, tpu.core_type = #tpu.core_type<tc>, window_params = [{pipeline_mode = #tpu.pipeline_mode<synchronous>, transform_indices = @transform_0, window_bounds = array<i64: 2, 32>}, {pipeline_mode = #tpu.pipeline_mode<synchronous>, transform_indices = @transform_1, window_bounds = array<i64: 32, 32>}, {pipeline_mode = #tpu.pipeline_mode<synchronous>, transform_indices = @transform_2, window_bounds = array<i64: 1, 32>}, {pipeline_mode = #tpu.pipeline_mode<synchronous>, transform_indices = @transform_3, window_bounds = array<i64: 32, 128>}, {pipeline_mode = #tpu.pipeline_mode<synchronous>, transform_indices = @transform_4, window_bounds = array<i64: 1, 128>}, {pipeline_mode = #tpu.pipeline_mode<synchronous>, transform_indices = @transform_5, window_bounds = array<i64: 2, 128>}]} {
    %c0 = arith.constant 0 : index
    %c0_0 = arith.constant 0 : index
    %0 = vector.load %arg1[%c0, %c0_0] : memref<2x32xbf16, #tpu.memory_space<vmem>>, vector<2x32xbf16>
    %c0_1 = arith.constant 0 : index
    %c0_2 = arith.constant 0 : index
    %1 = vector.load %arg2[%c0_1, %c0_2] : memref<32x32xbf16, #tpu.memory_space<vmem>>, vector<32x32xbf16>
    %cst = arith.constant dense<0.000000e+00> : vector<2x32xf32>
    %2 = tpu.matmul %0, %1, %cst {dimension_numbers = #tpu.dot_dimension_numbers<[1], [0], [0], [1], [0, 0, 1, 1], [], []>} : vector<2x32xbf16>, vector<32x32xbf16>, vector<2x32xf32> -> vector<2x32xf32>
    %c0_3 = arith.constant 0 : index
    %c0_4 = arith.constant 0 : index
    %3 = vector.load %arg3[%c0_3, %c0_4] : memref<1x32xf32, #tpu.memory_space<vmem>>, vector<1x32xf32>
    %4 = vector.broadcast %3 : vector<1x32xf32> to vector<2x32xf32>
    %5 = arith.addf %2, %4 : vector<2x32xf32>
    %6 = math.tanh %5 : vector<2x32xf32>
    %7 = arith.truncf %6 : vector<2x32xf32> to vector<2x32xbf16>
    %c0_5 = arith.constant 0 : index
    %c0_6 = arith.constant 0 : index
    %8 = vector.load %arg4[%c0_5, %c0_6] : memref<32x128xbf16, #tpu.memory_space<vmem>>, vector<32x128xbf16>
    %cst_7 = arith.constant dense<0.000000e+00> : vector<2x128xf32>
    %9 = tpu.matmul %7, %8, %cst_7 {dimension_numbers = #tpu.dot_dimension_numbers<[1], [0], [0], [1], [0, 0, 1, 1], [], []>} : vector<2x32xbf16>, vector<32x128xbf16>, vector<2x128xf32> -> vector<2x128xf32>
    %c0_8 = arith.constant 0 : index
    %c0_9 = arith.constant 0 : index
    %10 = vector.load %arg5[%c0_8, %c0_9] : memref<1x128xf32, #tpu.memory_space<vmem>>, vector<1x128xf32>
    %11 = vector.broadcast %10 : vector<1x128xf32> to vector<2x128xf32>
    %12 = arith.addf %9, %11 : vector<2x128xf32>
    %c0_10 = arith.constant 0 : index
    %c0_11 = arith.constant 0 : index
    %13 = vector.load %arg6[%c0_10, %c0_11] : memref<2x128xf32, #tpu.memory_space<vmem>>, vector<2x128xf32>
    tpu.vector_store %arg6[%c0_10, %c0_11], %12 {strides = array<i32>} : memref<2x128xf32, #tpu.memory_space<vmem>>, vector<2x128xf32>,
    return
  }
  func.func @transform_0(%arg0: i32) -> (i32, i32) {
    %c0_i32 = arith.constant 0 : i32
    %c0_i32_0 = arith.constant 0 : i32
    %c0_i32_1 = arith.constant 0 : i32
    return %c0_i32, %c0_i32_0 : i32, i32
  }
  func.func @transform_1(%arg0: i32) -> (i32, i32) {
    %c0_i32 = arith.constant 0 : i32
    %c0_i32_0 = arith.constant 0 : i32
    %c0_i32_1 = arith.constant 0 : i32
    return %c0_i32, %c0_i32_0 : i32, i32
  }
  func.func @transform_2(%arg0: i32) -> (i32, i32) {
    %c0_i32 = arith.constant 0 : i32
    %c0_i32_0 = arith.constant 0 : i32
    %c0_i32_1 = arith.constant 0 : i32
    return %c0_i32, %c0_i32_0 : i32, i32
  }
  func.func @transform_3(%arg0: i32) -> (i32, i32) {
    %c0_i32 = arith.constant 0 : i32
    %c0_i32_0 = arith.constant 0 : i32
    %c0_i32_1 = arith.constant 0 : i32
    return %c0_i32, %c0_i32_0 : i32, i32
  }
  func.func @transform_4(%arg0: i32) -> (i32, i32) {
    %c0_i32 = arith.constant 0 : i32
    %c0_i32_0 = arith.constant 0 : i32
    %c0_i32_1 = arith.constant 0 : i32
    return %c0_i32, %c0_i32_0 : i32, i32
  }
  func.func @transform_5(%arg0: i32) -> (i32, i32) {
    %c0_i32 = arith.constant 0 : i32
    %c0_i32_0 = arith.constant 0 : i32
    %c0_i32_1 = arith.constant 0 : i32
    return %c0_i32, %c0_i32_0 : i32, i32
  }
}

</mosaic_0001>

<bundles_post_ra>
// kernel: sentiment_model_forward.4
= control target key start
LH: loop header
LB: loop body
LE: loop exit
PB: predicated region body
PF: predicated region fallthrough
CT: control target
= control target key end

     0   :  { %vm18_vm0 = vcmask 261120   ;;  %v98_v4 = vmov 32.0   ;;  %vm82_vm6 = vcmask 257024   ;;  %s141_s0 = inlined_call_operand.vmem [shape: f32[16,32], index: 0, kind: input, shape index: {}]   ;;  %s142_s1 = inlined_call_operand.vmem [shape: f32[1,32], index: 1, kind: input, shape index: {}]   ;;  %s143_s2 = inlined_call_operand.vmem [shape: f32[1,32], index: 2, kind: input, shape index: {}]   ;;  %s144_s3 = inlined_call_operand.vmem [shape: bf16[16,32], index: 3, kind: output, shape index: {}]  }
   0x1   :  { %v14_v0 = vld [vmem:[%s141_s0] sm:$0xff]  ;;  %v15_v2 = vld [vmem:[%s141_s0 + $0x8] sm:$0xff]  ;;  %92 = vrcp.f32 %v98_v4 }
   0x2   :  { %v19_v1 = vsel %vm18_vm0, %v14_v0, 0.0  ;;  %v22_v3 = vsel %vm18_vm0, %v15_v2, 0.0  ;;  %v90_v35 = vld [vmem:[%s142_s1] ss:$0 sm:$0xff] }
   0x3   :  { %20 = vadd.xlane.f32.xlu0 %v19_v1  ;;  %v91_v38 = vld [vmem:[%s143_s2] ss:$0 sm:$0xff] }
   0x7   :  { %v93_v5 = vpop.eup %92 }
   0x8   :  { %v26_v6 = vmul.f32 32.0, %v93_v5  ;;  %vm30_vm1 = vweird.f32 %v93_v5 }
   0xa   :  { %v27_v7 = vsub.f32 1.0, %v26_v6 }
   0xb   :  { %23 = vadd.xlane.f32.xlu0 %v22_v3 }
   0xc   :  { %v28_v8 = vmul.f32 %v93_v5, %v27_v7 }
   0xe   :  { %v29_v9 = vadd.f32 %v93_v5, %v28_v8 }
  0x10   :  { %v31_v10 = vsel %vm30_vm1, %v93_v5, %v29_v9 }
  0x76   :  { %v21_v11 = vpop.xlane.xlu0 %20 }
  0x77   :  { %v32_v12 = vmul.f32 %v31_v10, %v21_v11 }
  0x79   :  { %v34_v13 = vsub.f32 %v14_v0, %v32_v12 }
  0x7b   :  { %v36_v14 = vmul.f32 %v34_v13, %v34_v13 }
  0x7d   :  { %v38_v15 = vsel %vm18_vm0, %v36_v14, 0.0 }
  0x7e   :  { %39 = vadd.xlane.f32.xlu1 %v38_v15  ;;  %v24_v16 = vpop.xlane.xlu0 %23 }
  0x7f   :  { %v33_v17 = vmul.f32 %v31_v10, %v24_v16 }
  0x81   :  { %v35_v18 = vsub.f32 %v15_v2, %v33_v17 }
  0x83   :  { %v37_v19 = vmul.f32 %v35_v18, %v35_v18 }
  0x85   :  { %v41_v20 = vsel %vm18_vm0, %v37_v19, 0.0 }
  0x86   :  { %42 = vadd.xlane.f32.xlu1 %v41_v20 }
  0xf1   :  { %v40_v21 = vpop.xlane.xlu1 %39 }
  0xf2   :  { %v44_v22 = vmul.f32 %v40_v21, %v31_v10 }
  0xf4   :  { %v46_v23 = vadd.f32 1e-12, %v44_v22 }
  0xf6   :  { %94 = vrsqrt.f32 %v46_v23  ;;  %vm54_vm3 = vweird.f32 %v46_v23 }
  0xf9   :  { %v43_v24 = vpop.xlane.xlu1 %42 }
  0xfa   :  { %v45_v25 = vmul.f32 %v43_v24, %v31_v10 }
  0xfc   :  { %v95_v26 = vpop.eup %94  ;;  %v47_v27 = vadd.f32 1e-12, %v45_v25 }
  0xfd   :  { %v49_v28 = vmul.f32 %v95_v26, %v46_v23  ;;  %vm55_vm2 = vweird.f32 %v95_v26 }
  0xfe   :  { %96 = vrsqrt.f32 %v47_v27  ;;  %vm56_vm4 = vmor %vm54_vm3, %vm55_vm2  ;;  %vm64_vm7 = vweird.f32 %v47_v27 }
  0xff   :  { %v50_v29 = vmul.f32 %v95_v26, %v49_v28 }
 0x101   :  { %v51_v30 = vmul.f32 0.5, %v50_v29 }
 0x103   :  { %v52_v31 = vsub.f32 1.5, %v51_v30 }
 0x104   :  { %v97_v32 = vpop.eup %96 }
 0x105   :  { %v53_v33 = vmul.f32 %v95_v26, %v52_v31  ;;  %v59_v34 = vmul.f32 %v97_v32, %v47_v27  ;;  %vm65_vm5 = vweird.f32 %v97_v32 }
 0x106   :  { %vm66_vm8 = vmor %vm64_vm7, %vm65_vm5 }
 0x107   :  { %v57_v36 = vsel %vm56_vm4, %v95_v26, %v53_v33  ;;  %v60_v37 = vmul.f32 %v97_v32, %v59_v34 }
 0x108   :  { %v68_v39 = vmul.f32 %v57_v36, %v34_v13 }
 0x109   :  { %v61_v40 = vmul.f32 0.5, %v60_v37 }
 0x10a   :  { %v73_v41 = vmul.f32 %v90_v35, %v68_v39 }
 0x10b   :  { %v62_v42 = vsub.f32 1.5, %v61_v40 }
 0x10c   :  { %v78_v43 = vadd.f32 %v91_v38, %v73_v41 }
 0x10d   :  { %v63_v44 = vmul.f32 %v97_v32, %v62_v42 }
 0x10e   :  { %v80_v45 = vpack.c.bf16 %v78_v43, %v78_v43 }
 0x10f   :  { %v67_v46 = vsel %vm66_vm8, %v97_v32, %v63_v44 }
 0x110   :  { %83 = vst.msk [vmem:[%s144_s3] sm:$0xf] %vm82_vm6, %v80_v45  ;;  %v69_v47 = vmul.f32 %v67_v46, %v35_v18 }
 0x112   :  { %v74_v48 = vmul.f32 %v90_v35, %v69_v47 }
 0x114   :  { %v79_v49 = vadd.f32 %v91_v38, %v74_v48 }
 0x116   :  { %v81_v50 = vpack.c.bf16 %v79_v49, %v79_v49 }
 0x118   :  { %84 = vst.msk [vmem:[%s144_s3 + $0x4] sm:$0xf] %vm82_vm6, %v81_v50 }

// kernel: sentiment_model_forward.7
= control target key start
LH: loop header
LB: loop body
LE: loop exit
PB: predicated region body
PF: predicated region fallthrough
CT: control target
= control target key end

     0   :  { %s223_s0 = inlined_call_operand.vmem [shape: bf16[2,32], index: 0, kind: input, shape index: {}]   ;;  %s224_s1 = inlined_call_operand.vmem [shape: bf16[32,32], index: 1, kind: input, shape index: {}]   ;;  %s225_s2 = inlined_call_operand.vmem [shape: f32[1,32], index: 2, kind: input, shape index: {}]   ;;  %s226_s3 = inlined_call_operand.vmem [shape: bf16[32,128], index: 3, kind: input, shape index: {}]   ;;  %s227_s4 = inlined_call_operand.vmem [shape: f32[1,128], index: 4, kind: input, shape index: {}]   ;;  %s228_s5 = inlined_call_operand.hbm [shape: f32[2,128], index: 5, kind: output, shape index: {}]  }
   0x1   :  { %v134_v0 = vld [vmem:[%s224_s1 + $0x8] sm:$0xff]  ;;  %v133_v1 = vld [vmem:[%s224_s1] sm:$0xff] }
   0x2   :  { %53 = vmatpush.bf16.msra.mxu0 %v134_v0 }
   0x3   :  { %10 = vsyncpa [#allocation3], 0  ;;  %v22_v2 = vld [vmem:[%s223_s0] sm:$0x1]  ;;  %vm43_vm0 = vcmask 261120   ;;  %v136_v3 = vld [vmem:[%s226_s3 + $0x8] sm:$0xff] }
   0x4   :  { %91 = vmatpush.bf16.msra.mxu1 %v136_v3  ;;  %v135_v4 = vld [vmem:[%s226_s3] sm:$0xff]  ;;  %s168_s30 = smov [#allocation2]   ;;  %s106_s8 = sshll.u32 %s228_s5, 4  ;;  %s107_s8 = int_to_ptr.hbm [resolvable:$true] %s106_s8 }
   0x5   :  { %v138_v5 = vld [vmem:[%s225_s2] ss:$0 sm:$0xff]  ;;  %s104_s6 = sshll.u32 %s168_s30, 4  ;;  %s105_s6 = int_to_ptr.vmem [resolvable:$true] %s104_s6 }
   0x6   :  { %54 = vmatpush.bf16.msra.mxu0 %v133_v1  ;;  %v139_v11 = vld [vmem:[%s227_s4] ss:$0 sm:$0xff] }
   0x8   :  { %92 = vmatpush.bf16.msra.mxu1 %v135_v4 }
   0x9   :  { %123 = vmatmul.msk.bf16.vlgmr.msra.gmra.mxu0 %vm43_vm0, %v22_v2 }
  0x86   :  { %v56_v6 = vpop.f32.mrf.mxu0 }
  0x87   :  { %v57_v7 = vadd.f32 %v138_v5, %v56_v6 }
  0x89   :  { %140 = vtanh.f32 %v57_v7 }
  0x8e   :  { %v58_v8 = vpop.f32.mrf.mxu0 }
  0x8f   :  { %v141_v9 = vpop.eup %140 }
  0x90   :  { %v61_v10 = vpack.c.bf16 %v141_v9, %v141_v9 }
  0x92   :  { %132 = vmatmul.msk.bf16.vlgmr.msra.gmra.mxu1 %vm43_vm0, %v61_v10 }
 0x10f   :  { %v94_v12 = vpop.f32.mrf.mxu1 }
 0x110   :  { %v95_v13 = vadd.f32 %v139_v11, %v94_v12 }
 0x112   :  { %98 = vst [vmem:[#allocation2] sm:$0x3] %v95_v13 }
 0x113   :  { %109 = dma.vmem_to_hbm [thread:$0]  %s105_s6, 32, %s107_s8, [#allocation3]  }
 0x117   :  { %v96_v14 = vpop.f32.mrf.mxu1 }
 0x118   :  { %166 = dma.done.wait [#allocation3], 32  }
 0x119   :  { %167 = vsyncadd [#allocation3], 4294967264 }
 0x11a   :  { %114 = vsyncpa [#allocation3], 1 }

// kernel: sentiment_model_forward.5
= control target key start
LH: loop header
LB: loop body
LE: loop exit
PB: predicated region body
PF: predicated region fallthrough
CT: control target
= control target key end

     0   :  { %s1267_s29 = smov 0   ;;  %s1406_s0 = inlined_call_operand.vmem [shape: bf16[2,8,32], index: 0, kind: input, shape index: {}]   ;;  %s1407_s1 = inlined_call_operand.vmem [shape: f32[2,1,8], index: 1, kind: input, shape index: {}]   ;;  %s1408_s2 = inlined_call_operand.vmem [shape: bf16[32,96], index: 2, kind: input, shape index: {}]   ;;  %s1409_s3 = inlined_call_operand.vmem [shape: f32[1,96], index: 3, kind: input, shape index: {}]   ;;  %s1410_s4 = inlined_call_operand.vmem [shape: bf16[32,32], index: 4, kind: input, shape index: {}]   ;;  %s1411_s5 = inlined_call_operand.vmem [shape: f32[1,32], index: 5, kind: input, shape index: {}]   ;;  %s1412_s6 = inlined_call_operand.vmem [shape: f32[1,32], index: 6, kind: input, shape index: {}]   ;;  %s1413_s7 = inlined_call_operand.vmem [shape: f32[1,32], index: 7, kind: input, shape index: {}]   ;;  %s1414_s8 = inlined_call_operand.vmem [shape: bf16[32,64], index: 8, kind: input, shape index: {}]   ;;  %s1415_s9 = inlined_call_operand.vmem [shape: f32[1,64], index: 9, kind: input, shape index: {}]   ;;  %s1416_s10 = inlined_call_operand.vmem [shape: bf16[64,32], index: 10, kind: input, shape index: {}]   ;;  %s1417_s11 = inlined_call_operand.vmem [shape: f32[1,32], index: 11, kind: input, shape index: {}]   ;;  %s1418_s12 = inlined_call_operand.vmem [shape: f32[1,32], index: 12, kind: input, shape index: {}]   ;;  %s1419_s13 = inlined_call_operand.vmem [shape: f32[1,32], index: 13, kind: input, shape index: {}]   ;;  %s1420_s14 = inlined_call_operand.vmem [shape: bf16[2,8,32], index: 14, kind: output, shape index: {}]  }
   0x1 LB: > { %s1042_s30 = sadd.s32 4294967295, %s1175_s29   ;;  %p1046_p0 = scmp.ge.s32.totalorder %s1175_s29, 1  ;;  %s1175_s29 = sphi %s1267_s29, %s24_s29  }
   0x2   : > { %p419_p1 = scmp.lt.s32.totalorder %s1175_s29, 3 }
   0x4   : > { %p420_p2 = pnand %p1046_p0, %p419_p1 }
   0x5   : > { %p466_p3 = scmp.lt.s32.totalorder (!%p420_p2), %s1042_s30, 1  ;;  %s1177_s28 = smov (!%p420_p2), 96  }
   0x6   : > { %423 = sbr.rel (%p420_p2) target bundleno = 1910 (0x776), region = 76  ;;  %s1178_s15 = smov (!%p420_p2), 104  }
   0x7   : > { %s1179_s16 = smov (!%p420_p2), 120   ;;  %s1180_s17 = smov (!%p420_p2), 88  }
   0x8   : > { %s1181_s18 = smov (!%p420_p2), 80   ;;  %s1182_s20 = smov (!%p420_p2), 72  }
   0x9   : > { %s1183_s21 = smov (!%p420_p2), 112   ;;  %s1186_s26 = smov (!%p420_p2), 56  }
   0xa   : > { %s1187_s27 = smov (!%p420_p2), 48  }
   0xb   : > { %v1104_v0 = vld [vmem:[%s1408_s2 + $0x8] sm:$0xff]  ;;  %v1103_v1 = vld [vmem:[%s1408_s2] sm:$0xff]  ;;  %s1422_s30 = smov (!%p466_p3, %s1042_s30), 1  ;;  %vm501_vm0 = vcmask 261120   ;;  %vm527_vm1 = vcmask 64512   ;;  %vm564_vm2 = vcmask 1043456  }
   0xc   : > { %511 = vmatpush.bf16.msra.mxu0 %v1104_v0  ;;  %s1047_s19 = sshll.u32 %s1422_s30, 2  ;;  %s472_s22 = scalar_lea.vmem %s1407_s1, %s1422_s30  ;;  %v1137_v3 = vld [vmem:[%s1409_s3] ss:$0 sm:$0xff]  ;;  %vm763_vm3 = vcmask 130048   ;;  %vm765_vm4 = vcmask 195584   ;;  %vm927_vm9 = vcmask 523264  }
   0xd   : > { %s469_s25 = scalar_lea.vmem %s1406_s0, %s1047_s19  ;;  %v1136_v21 = vld [vmem:[%s472_s22] ss:$0 sm:$0xff]  ;;  %s1184_s22 = smov 64   ;;  %vm978_vm13 = vcmask 257024  }
   0xe   : > { %v1293_v2 = vld [vmem:[%s469_s25] sm:$0xf]  ;;  %s1185_s25 = smov 40  }
  0x10   : > { %512 = vmatpush.bf16.msra.mxu0 %v1103_v1 }
  0x13   : > { %1057 = vmatmul.msk.bf16.vlgmr.msra.gmra.mxu0 %vm501_vm0, %v1293_v2 }
  0x90   : > { %v514_v4 = vpop.f32.mrf.mxu0 }
  0x91   : > { %v515_v5 = vadd.f32 %v1137_v3, %v514_v4 }
  0x93   : > { %v518_v6 = vmul.f32 0.35355338, %v515_v5  ;;  %v1300_v7 = vpack.c.bf16 %v515_v5, %v515_v5 }
  0x95   : > { %v519_v8 = vpack.c.bf16 %v518_v6, %v518_v6  ;;  %525 = vrot.lane.b32.xlu0 %v1300_v7, %s1177_s28  ;;  %s1188_s28 = smov 8  }
  0x97   : > { %694 = vrot.lane.b32.xlu2 %v519_v8, %s1178_s15  ;;  %582 = vrot.lane.b32.xlu1 %v519_v8, %s1179_s16  ;;  %s1189_s15 = smov 16   ;;  %s1190_s16 = smov 24  }
  0x98   : > { %v516_v9 = vpop.f32.mrf.mxu0 }
  0x9d   : > { %584 = vrot.lane.b32.xlu0 %v1300_v7, %s1180_s17 }
  0x9f   : > { %640 = vrot.lane.b32.xlu2 %v1300_v7, %s1181_s18  ;;  %696 = vrot.lane.b32.xlu1 %v1300_v7, %s1182_s20 }
  0xa5   : > { %638 = vrot.lane.b32.xlu0 %v519_v8, %s1183_s21 }
  0xf1   : > { %v695_v10 = vpop.permute.xlu2 %694 }
  0xf9   : > { %v641_v11 = vpop.permute.xlu2 %640 }
  0xfa   : > { %v646_v12 = vsel %vm527_vm1, %v641_v11, 0 }
  0xfb   : > { %655 = vmatpush.bf16.xpose.msrb.mxu0 %v646_v12 }
 0x107   : > { %v526_v13 = vpop.permute.xlu0 %525 }
 0x108   : > { %v532_v14 = vsel %vm527_vm1, %v526_v13, 0 }
 0x109   : > { %541 = vmatpush.bf16.xpose.msra.mxu1 %v532_v14  ;;  %v583_v15 = vpop.permute.xlu1 %582 }
 0x10f   : > { %v585_v16 = vpop.permute.xlu0 %584 }
 0x110   : > { %1058 = vmatmul.msk.bf16.vlgmr.msra.gmra.mxu1 %vm527_vm1, %v519_v8  ;;  %v590_v17 = vsel %vm527_vm1, %v585_v16, 0 }
 0x111   : > { %599 = vmatpush.bf16.xpose.msra.mxu3 %v590_v17  ;;  %v697_v18 = vpop.permute.xlu1 %696 }
 0x112   : > { %v702_v19 = vsel %vm527_vm1, %v697_v18, 0 }
 0x117   : > { %v639_v20 = vpop.permute.xlu0 %638 }
 0x118   : > { %1060 = vmatmul.msk.bf16.vlgmr.msra.gmra.mxu3 %vm527_vm1, %v583_v15  ;;  %1062 = vmatmul.msk.bf16.vlgmr.msrb.gmra.mxu0 %vm527_vm1, %v639_v20 }
 0x119   : > { %711 = vmatpush.bf16.xpose.msrb.mxu3 %v702_v19 }
 0x128   : > { %1064 = vmatmul.msk.bf16.vlgmr.msrb.gmra.mxu3 %vm527_vm1, %v695_v10 }
 0x18d   : > { %v543_v22 = vpop.f32.mrf.mxu1 }
 0x18e   : > { %v544_v23 = vadd.f32 %v1136_v21, %v543_v22 }
 0x190   : > { %v547_v24 = vsel %vm527_vm1, %v544_v23, -inf }
 0x191   : > { %548 = vmax.xlane.f32.xlu1 %v547_v24 }
 0x195   : > { %v545_v25 = vpop.f32.mrf.mxu1  ;;  %v657_v26 = vpop.f32.mrf.mxu0 }
 0x196   : > { %v658_v31 = vadd.f32 %v1136_v21, %v657_v26 }
 0x198   : > { %v661_v33 = vsel %vm527_vm1, %v658_v31, -inf }
 0x19b   : > { %v601_v27 = vpop.f32.mrf.mxu3 }
 0x19c   : > { %v602_v28 = vadd.f32 %v1136_v21, %v601_v27  ;;  %v1106_v27 = vld [vmem:[%s1410_s4 + $0x8] sm:$0xff] }
 0x19d   : > { %v659_v29 = vpop.f32.mrf.mxu0  ;;  %797 = vmatpush.bf16.msra.mxu0 %v1106_v27  ;;  %v1142_v27 = vld [vmem:[%s1417_s11] ss:$0 sm:$0xff] }
 0x19e   : > { %v605_v30 = vsel %vm527_vm1, %v602_v28, -inf }
 0x19f   : > { %606 = vmax.xlane.f32.xlu2 %v605_v30 }
 0x1a3   : > { %v603_v32 = vpop.f32.mrf.mxu3 }
 0x1a7   : > { %662 = vmax.xlane.f32.xlu2 %v661_v33 }
 0x1ab   : > { %v713_v34 = vpop.f32.mrf.mxu3 }
 0x1ac   : > { %v714_v35 = vadd.f32 %v1136_v21, %v713_v34 }
 0x1ae   : > { %v717_v36 = vsel %vm527_vm1, %v714_v35, -inf }
 0x1af   : > { %718 = vmax.xlane.f32.xlu0 %v717_v36  ;;  %v1138_v36 = vld [vmem:[%s1411_s5] ss:$0 sm:$0xff] }
 0x1b3   : > { %v715_v37 = vpop.f32.mrf.mxu3 }
 0x1b4   : > { %v479_v37 = vunpack.c.l.bf16 %v1293_v2 }
 0x1bf   : > { %559 = vrot.lane.b32.xlu2 %v1300_v7, %s1184_s22  ;;  %s476_s22 = scalar_lea.vmem %s1420_s14, %s1047_s19 }
 0x1c7   : > { %729 = vrot.lane.b32.xlu2 %v1300_v7, %s1185_s25 }
 0x204   : > { %v549_v38 = vpop.xlane.xlu1 %548 }
 0x205   : > { %v550_v39 = vsub.f32 %v544_v23, %v549_v38 }
 0x207   : > { %v551_v40 = vmul.f32 1.442695, %v550_v39 }
 0x209   : > { %1145 = vpow2.f32 %v551_v40 }
 0x20f   : > { %v1146_v41 = vpop.eup %1145 }
 0x210   : > { %v553_v42 = vsel %vm527_vm1, %v1146_v41, 0.0 }
 0x211   : > { %554 = vadd.xlane.f32.xlu1 %v553_v42 }
 0x212   : > { %v607_v43 = vpop.xlane.xlu2 %606 }
 0x213   : > { %v608_v46 = vsub.f32 %v602_v28, %v607_v43  ;;  %v1105_v28 = vld [vmem:[%s1410_s4] sm:$0xff]  ;;  %v1191_v43 = vmov 32.0  }
 0x214   : > { %798 = vmatpush.bf16.msra.mxu0 %v1105_v28 }
 0x215   : > { %v609_v48 = vmul.f32 1.442695, %v608_v46 }
 0x21a   : > { %v663_v44 = vpop.xlane.xlu2 %662 }
 0x21b   : > { %v664_v45 = vsub.f32 %v658_v31, %v663_v44 }
 0x21d   : > { %v665_v47 = vmul.f32 1.442695, %v664_v45 }
 0x21f   : > { %1147 = vpow2.f32 %v665_v47 }
 0x220   : > { %1149 = vpow2.f32 %v609_v48 }
 0x222   : > { %v560_v49 = vpop.permute.xlu2 %559  ;;  %v719_v50 = vpop.xlane.xlu0 %718 }
 0x223   : > { %v566_v51 = vsel %vm564_vm2, %v560_v49, 0  ;;  %v720_v53 = vsub.f32 %v714_v35, %v719_v50 }
 0x224   : > { %575 = vmatpush.bf16.msra.mxu2 %v566_v51 }
 0x225   : > { %v1148_v52 = vpop.eup %1147  ;;  %v721_v55 = vmul.f32 1.442695, %v720_v53 }
 0x226   : > { %v667_v54 = vsel %vm527_vm1, %v1148_v52, 0.0  ;;  %v1150_v56 = vpop.eup %1149 }
 0x227   : > { %668 = vadd.xlane.f32.xlu0 %v667_v54  ;;  %1151 = vpow2.f32 %v721_v55  ;;  %v611_v57 = vsel %vm527_vm1, %v1150_v56, 0.0  ;;  %v1108_v54 = vld [vmem:[%s1414_s8 + $0x8] sm:$0xff]  ;;  %v1107_v55 = vld [vmem:[%s1414_s8] sm:$0xff] }
 0x22a   : > { %617 = vrot.lane.b32.xlu1 %v1300_v7, %s1186_s26  ;;  %v730_v1 = vpop.permute.xlu2 %729 }
 0x22b   : > { %v735_v5 = vsel %vm564_vm2, %v730_v1, 0  ;;  %v1139_v1 = vld [vmem:[%s1412_s6] ss:$0 sm:$0xff] }
 0x22d   : > { %v1152_v58 = vpop.eup %1151 }
 0x22e   : > { %v723_v59 = vsel %vm527_vm1, %v1152_v58, 0.0 }
 0x22f   : > { %612 = vadd.xlane.f32.xlu0 %v611_v57 }
 0x237   : > { %724 = vadd.xlane.f32.xlu0 %v723_v59 }
 0x24b   : > { %673 = vrot.lane.b32.xlu0 %v1300_v7, %s1187_s27 }
 0x284   : > { %v555_v60 = vpop.xlane.xlu1 %554 }
 0x285   : > { %1153 = vrcp.f32 %v555_v60 }
 0x28b   : > { %v1154_v61 = vpop.eup %1153 }
 0x28c   : > { %v557_v62 = vmul.f32 %v1154_v61, %v1146_v41 }
 0x28e   : > { %v558_v63 = vpack.c.bf16 %v557_v62, %v557_v62 }
 0x290   : > { %1059 = vmatmul.msk.bf16.vlgmr.msra.gmra.mxu2 %vm527_vm1, %v558_v63 }
 0x29a   : > { %v669_v0 = vpop.xlane.xlu0 %668 }
 0x29c   : > { %v618_v3 = vpop.permute.xlu1 %617 }
 0x29d   : > { %v623_v4 = vsel %vm564_vm2, %v618_v3, 0 }
 0x29e   : > { %632 = vmatpush.bf16.msrb.mxu2 %v623_v4  ;;  %v1140_v4 = vld [vmem:[%s1413_s7] ss:$0 sm:$0xff] }
 0x2a2   : > { %744 = vmatpush.bf16.msra.mxu2 %v735_v5  ;;  %v613_v6 = vpop.xlane.xlu0 %612 }
 0x2a3   : > { %1155 = vrcp.f32 %v613_v6 }
 0x2a9   : > { %v1156_v8 = vpop.eup %1155 }
 0x2aa   : > { %v615_v7 = vmul.f32 %v1156_v8, %v1150_v56  ;;  %v725_v9 = vpop.xlane.xlu0 %724 }
 0x2ab   : > { %1157 = vrcp.f32 %v725_v9  ;;  %v1112_v9 = vld [vmem:[%s1416_s10 + $0x18] sm:$0xff] }
 0x2ac   : > { %v616_v10 = vpack.c.bf16 %v615_v7, %v615_v7  ;;  %1159 = vrcp.f32 %v669_v0  ;;  %935 = vmatpush.bf16.msra.mxu3 %v1112_v9 }
 0x2ad   : > { %1161 = vrcp.f32 %v1191_v43 }
 0x2ae   : > { %1061 = vmatmul.msk.bf16.vlgmr.msrb.gmra.mxu2 %vm527_vm1, %v616_v10  ;;  %v1111_v10 = vld [vmem:[%s1416_s10 + $0x10] sm:$0xff] }
 0x2b0   : > { %936 = vmatpush.bf16.msra.mxu3 %v1111_v10 }
 0x2b1   : > { %v1158_v11 = vpop.eup %1157 }
 0x2b2   : > { %v727_v12 = vmul.f32 %v1158_v11, %v1152_v58  ;;  %v1160_v13 = vpop.eup %1159  ;;  %v1110_v11 = vld [vmem:[%s1416_s10 + $0x8] sm:$0xff] }
 0x2b3   : > { %v671_v14 = vmul.f32 %v1160_v13, %v1148_v52  ;;  %v1162_v44 = vpop.eup %1161  ;;  %v1141_v13 = vld [vmem:[%s1415_s9] ss:$0 sm:$0xff] }
 0x2b4   : > { %v728_v15 = vpack.c.bf16 %v727_v12, %v727_v12  ;;  %v811_v45 = vmul.f32 32.0, %v1162_v44  ;;  %vm815_vm5 = vweird.f32 %v1162_v44  ;;  %937 = vmatpush.bf16.msra.mxu3 %v1110_v11  ;;  %v1109_v12 = vld [vmem:[%s1416_s10] sm:$0xff] }
 0x2b5   : > { %v672_v18 = vpack.c.bf16 %v671_v14, %v671_v14 }
 0x2b6   : > { %v812_v46 = vsub.f32 1.0, %v811_v45 }
 0x2b8   : > { %v813_v47 = vmul.f32 %v1162_v44, %v812_v46  ;;  %938 = vmatpush.bf16.msra.mxu3 %v1109_v12 }
 0x2ba   : > { %v814_v48 = vadd.f32 %v1162_v44, %v813_v47  ;;  %v1143_v47 = vld [vmem:[%s1418_s12] ss:$0 sm:$0xff] }
 0x2bc   : > { %v1352_v49 = vsel %vm815_vm5, %v1162_v44, %v814_v48 }
 0x2bd   : > { %v674_v16 = vpop.permute.xlu0 %673 }
 0x2be   : > { %1065 = vmatmul.msk.bf16.vlgmr.msra.gmra.mxu2 %vm527_vm1, %v728_v15  ;;  %v679_v17 = vsel %vm564_vm2, %v674_v16, 0 }
 0x2bf   : > { %688 = vmatpush.bf16.msrb.mxu1 %v679_v17 }
 0x2c2   : > { %1063 = vmatmul.msk.bf16.vlgmr.msrb.gmra.mxu1 %vm527_vm1, %v672_v18 }
 0x2c3   : > { %874 = vmatpush.bf16.msra.mxu1 %v1108_v54 }
 0x2c7   : > { %875 = vmatpush.bf16.msra.mxu1 %v1107_v55 }
 0x313   : > { %v577_v19 = vpop.f32.mrf.mxu2 }
 0x31b   : > { %v579_v20 = vpop.f32.mrf.mxu2 }
 0x331   : > { %v634_v21 = vpop.f32.mrf.mxu2 }
 0x332   : > { %751 = vrot.lane.b32.xlu1 %v634_v21, %s1188_s28 }
 0x339   : > { %v636_v22 = vpop.f32.mrf.mxu2 }
 0x33f   : > { %v690_v23 = vpop.f32.mrf.mxu1 }
 0x340   : > { %755 = vrot.lane.b32.xlu2 %v690_v23, %s1189_s15 }
 0x341   : > { %v746_v24 = vpop.f32.mrf.mxu2 }
 0x342   : > { %759 = vrot.lane.b32.xlu1 %v746_v24, %s1190_s16 }
 0x347   : > { %v692_v25 = vpop.f32.mrf.mxu1 }
 0x349   : > { %v748_v26 = vpop.f32.mrf.mxu2 }
 0x39a   : > { %v756_v31 = vpop.permute.xlu2 %755 }
 0x3a4   : > { %v752_v29 = vpop.permute.xlu1 %751 }
 0x3a5   : > { %v762_v30 = vsel %vm527_vm1, %v577_v19, %v752_v29 }
 0x3a6   : > { %v764_v32 = vsel %vm763_vm3, %v762_v30, %v756_v31 }
 0x3b4   : > { %v760_v33 = vpop.permute.xlu1 %759 }
 0x3b5   : > { %v766_v34 = vsel %vm765_vm4, %v764_v32, %v760_v33 }
 0x3b6   : > { %v767_v35 = vpack.c.bf16 %v766_v34, %v766_v34 }
 0x3b8   : > { %1074 = vmatmul.msk.bf16.vlgmr.msra.gmra.mxu0 %vm501_vm0, %v767_v35 }
 0x435   : > { %v800_v38 = vpop.f32.mrf.mxu0 }
 0x436   : > { %v801_v39 = vadd.f32 %v1138_v36, %v800_v38 }
 0x438   : > { %v804_v40 = vadd.f32 %v801_v39, %v479_v37 }
 0x43a   : > { %v807_v41 = vsel %vm501_vm0, %v804_v40, 0.0 }
 0x43b   : > { %808 = vadd.xlane.f32.xlu2 %v807_v41 }
 0x43d   : > { %v802_v42 = vpop.f32.mrf.mxu0 }
 0x4ae   : > { %v809_v50 = vpop.xlane.xlu2 %808 }
 0x4af   : > { %v817_v2 = vmul.f32 %v1352_v49, %v809_v50 }
 0x4b1   : > { %v818_v51 = vsub.f32 %v804_v40, %v817_v2 }
 0x4b3   : > { %v819_v52 = vmul.f32 %v818_v51, %v818_v51 }
 0x4b5   : > { %v820_v53 = vsel %vm501_vm0, %v819_v52, 0.0 }
 0x4b6   : > { %821 = vadd.xlane.f32.xlu1 %v820_v53 }
 0x529   : > { %v822_v56 = vpop.xlane.xlu1 %821 }
 0x52a   : > { %v823_v57 = vmul.f32 %v822_v56, %v1352_v49 }
 0x52c   : > { %v824_v58 = vadd.f32 1e-12, %v823_v57 }
 0x52e   : > { %1163 = vrsqrt.f32 %v824_v58  ;;  %vm831_vm7 = vweird.f32 %v824_v58 }
 0x534   : > { %v1164_v59 = vpop.eup %1163 }
 0x535   : > { %v826_v60 = vmul.f32 %v1164_v59, %v824_v58  ;;  %vm832_vm6 = vweird.f32 %v1164_v59 }
 0x536   : > { %vm833_vm8 = vmor %vm831_vm7, %vm832_vm6 }
 0x537   : > { %v827_v61 = vmul.f32 %v1164_v59, %v826_v60 }
 0x539   : > { %v828_v62 = vmul.f32 0.5, %v827_v61 }
 0x53b   : > { %v829_v63 = vsub.f32 1.5, %v828_v62 }
 0x53d   : > { %v830_v0 = vmul.f32 %v1164_v59, %v829_v63 }
 0x53f   : > { %v834_v3 = vsel %vm833_vm8, %v1164_v59, %v830_v0 }
 0x540   : > { %v835_v5 = vmul.f32 %v834_v3, %v818_v51 }
 0x542   : > { %v839_v6 = vmul.f32 %v1139_v1, %v835_v5 }
 0x544   : > { %v843_v8 = vadd.f32 %v1140_v4, %v839_v6 }
 0x546   : > { %v844_v7 = vpack.c.bf16 %v843_v8, %v843_v8 }
 0x548   : > { %1083 = vmatmul.msk.bf16.vlgmr.msra.gmra.mxu1 %vm501_vm0, %v844_v7 }
 0x5c5   : > { %v877_v14 = vpop.f32.mrf.mxu1 }
 0x5c6   : > { %v878_v15 = vadd.f32 %v1141_v13, %v877_v14 }
 0x5c8   : > { %v882_v16 = vmul.f32 0.044715, %v878_v15  ;;  %v881_v23 = vmul.f32 0.5, %v878_v15 }
 0x5ca   : > { %v883_v17 = vmul.f32 %v882_v16, %v878_v15 }
 0x5cc   : > { %v884_v18 = vmul.f32 %v883_v17, %v878_v15 }
 0x5cd   : > { %v879_v19 = vpop.f32.mrf.mxu1 }
 0x5ce   : > { %v885_v20 = vadd.f32 %v884_v18, %v878_v15 }
 0x5d0   : > { %v886_v21 = vmul.f32 0.7978846, %v885_v20 }
 0x5d2   : > { %1165 = vtanh.f32 %v886_v21 }
 0x5d8   : > { %v1166_v22 = vpop.eup %1165 }
 0x5d9   : > { %v888_v24 = vadd.f32 1.0, %v1166_v22 }
 0x5db   : > { %v889_v25 = vmul.f32 %v888_v24, %v881_v23 }
 0x5dd   : > { %v890_v26 = vpack.c.bf16 %v889_v25, %v889_v25 }
 0x5df   : > { %1100 = vmatmul.msk.bf16.vlgmr.msra.gmra.mxu3 %vm927_vm9, %v890_v26 }
 0x662   : > { %v940_v28 = vpop.f32.mrf.mxu3 }
 0x663   : > { %v941_v29 = vadd.f32 %v1142_v27, %v940_v28 }
 0x665   : > { %v944_v30 = vadd.f32 %v941_v29, %v843_v8 }
 0x667   : > { %v947_v31 = vsel %vm501_vm0, %v944_v30, 0.0 }
 0x668   : > { %948 = vadd.xlane.f32.xlu0 %v947_v31 }
 0x66a   : > { %v942_v32 = vpop.f32.mrf.mxu3 }
 0x6db   : > { %v949_v33 = vpop.xlane.xlu0 %948 }
 0x6dc   : > { %v950_v34 = vmul.f32 %v949_v33, %v1352_v49 }
 0x6de   : > { %v951_v35 = vsub.f32 %v944_v30, %v950_v34 }
 0x6e0   : > { %v952_v36 = vmul.f32 %v951_v35, %v951_v35 }
 0x6e2   : > { %v953_v37 = vsel %vm501_vm0, %v952_v36, 0.0 }
 0x6e3   : > { %954 = vadd.xlane.f32.xlu2 %v953_v37 }
 0x756   : > { %v955_v38 = vpop.xlane.xlu2 %954 }
 0x757   : > { %v956_v39 = vmul.f32 %v955_v38, %v1352_v49  ;;  %v1144_v49 = vld [vmem:[%s1419_s13] ss:$0 sm:$0xff] }
 0x759   : > { %v957_v40 = vadd.f32 1e-12, %v956_v39 }
 0x75b   : > { %1167 = vrsqrt.f32 %v957_v40  ;;  %vm964_vm11 = vweird.f32 %v957_v40 }
 0x761   : > { %v1168_v41 = vpop.eup %1167 }
 0x762   : > { %v959_v42 = vmul.f32 %v1168_v41, %v957_v40  ;;  %vm965_vm10 = vweird.f32 %v1168_v41 }
 0x763   : > { %vm966_vm12 = vmor %vm964_vm11, %vm965_vm10 }
 0x764   : > { %v960_v43 = vmul.f32 %v1168_v41, %v959_v42 }
 0x766   : > { %v961_v44 = vmul.f32 0.5, %v960_v43 }
 0x768   : > { %v962_v45 = vsub.f32 1.5, %v961_v44 }
 0x76a   : > { %v963_v46 = vmul.f32 %v1168_v41, %v962_v45 }
 0x76c   : > { %v967_v48 = vsel %vm966_vm12, %v1168_v41, %v963_v46 }
 0x76d   : > { %v968_v50 = vmul.f32 %v967_v48, %v951_v35 }
 0x76f   : > { %v972_v2 = vmul.f32 %v1143_v47, %v968_v50 }
 0x771   : > { %v976_v51 = vadd.f32 %v1144_v49, %v972_v2 }
 0x773   : > { %v977_v52 = vpack.c.bf16 %v976_v51, %v976_v51 }
 0x775   : > { %979 = vst.msk [vmem:[%s476_s22] sm:$0xf] %vm978_vm13, %v977_v52 }
 0x776 PF: > { %s24_s29 = sadd.s32 1, %s1175_s29  }
 0x777   : > { %p21_p4 = scmp.ge.s32.totalorder %s24_s29, 4  }
 0x779   :  { %23 = sbr.rel (!%p21_p4) target bundleno = 1 (0x1), region = 109 }

</bundles_post_ra>
